<compile_context>
chip_gen: v6e
topology: v6e:2x2x1
jax: 0.10.0
libtpu: 0.0.40
codegen_flags: <defaults>
</compile_context>

<pallas_src>
import jax
import jax.numpy as jnp
from jax.experimental import pallas as pl
from jax.experimental.pallas import tpu as pltpu

DTYPE_MM = jnp.bfloat16  # matmul operand dtype (native MXU path on v5e/v6e/v7x)


# ----------------------------------------------------------------------------- kernel ----
def _irevnet_block_kernel(x1_ref, x2_ref, s_up_ref, s_dn_ref,
                          bn0s_ref, bn0b_ref,
                          w1_ref, bn1b_ref,
                          w2_ref, bn2b_ref,
                          w3_ref,
                          y1_ref):
    """One batch image per grid step; all activations in (H, W*c) slab layout.

    x1_ref, x2_ref, y1_ref : (H, W*C) f32 slabs (row-major flatten of one NHWC image)
    s_up_ref, s_dn_ref     : (H, H) bf16 row-shift matrices (sub-/super-diagonal of ones)
    bn*_ref                : (1, W*c) f32 BN scale/shift pre-tiled to the slab lane layout
    w*_ref                 : (3, W*cin, W*cout) bf16 banded slab conv weights (dy-indexed)
    """
    s_up = s_up_ref[...]   # row h of (s_up @ a) holds input row h-1 (row 0 -> zeros)
    s_dn = s_dn_ref[...]   # row h of (s_dn @ a) holds input row h+1 (row H-1 -> zeros)

    def conv3x3(a_f32, w_ref):
        # a_f32: (H, W*cin) f32.  Returns (H, W*cout) f32.
        a = a_f32.astype(DTYPE_MM)
        a_up = jnp.dot(s_up, a, preferred_element_type=jnp.float32).astype(DTYPE_MM)
        a_dn = jnp.dot(s_dn, a, preferred_element_type=jnp.float32).astype(DTYPE_MM)
        out = jnp.dot(a_up, w_ref[0], preferred_element_type=jnp.float32)
        out += jnp.dot(a, w_ref[1], preferred_element_type=jnp.float32)
        out += jnp.dot(a_dn, w_ref[2], preferred_element_type=jnp.float32)
        return out

    # BN0 + ReLU on x2, then the three convs (BN1/BN2 scales are folded into w1/w2;
    # Dropout(p=0.0) is the identity).
    a = jnp.maximum(x2_ref[...] * bn0s_ref[...] + bn0b_ref[...], 0.0)   # (H, W*C)
    a = conv3x3(a, w1_ref)                                              # (H, W*M)
    a = jnp.maximum(a + bn1b_ref[...], 0.0)
    a = conv3x3(a, w2_ref)                                              # (H, W*M)
    a = jnp.maximum(a + bn2b_ref[...], 0.0)
    fx2 = conv3x3(a, w3_ref)                                            # (H, W*C)

    y1_ref[...] = (fx2 + x1_ref[...]).astype(y1_ref.dtype)              # y1 = Fx2 + x1


# ----------------------------------------------------------------------- param packing ----
def _banded_slab_weight(w_hwio, W, out_scale=None):
    """(3,3,cin,cout) HWIO conv weight -> (3, W*cin, W*cout) banded slab weights.

    big[ky, w_in*cin + i, w_out*cout + o] = w[ky, w_in - w_out + 1, i, o]   (0 if |w_in-w_out|>1)
    so  out_slab[h] = sum_ky  in_slab[h + ky - 1] @ big[ky]  reproduces a SAME 3x3 conv
    (column zero padding is built into the band; row padding comes from the shift matrices).
    """
    _, _, cin, cout = w_hwio.shape
    w = w_hwio if out_scale is None else w_hwio * out_scale.reshape(1, 1, 1, cout)
    w_in = jnp.arange(W)[:, None]
    w_out = jnp.arange(W)[None, :]
    kx = w_in - w_out + 1                                    # (W, W)
    valid = ((kx >= 0) & (kx <= 2)).astype(w.dtype)
    taps = w[:, jnp.clip(kx, 0, 2)]                          # (3, W, W, cin, cout)
    taps = taps * valid[None, :, :, None, None]
    return jnp.transpose(taps, (0, 1, 3, 2, 4)).reshape(3, W * cin, W * cout)


def pack_params(params, H, W):
    """Fold BN scales into conv weights, pre-tile BN vectors to slab lanes, build shift mats."""
    return {
        "s_up": jnp.eye(H, k=-1, dtype=DTYPE_MM),
        "s_dn": jnp.eye(H, k=1, dtype=DTYPE_MM),
        "bn0s": jnp.tile(params["bn0_scale"], (1, W)),                                  # (1, W*C)
        "bn0b": jnp.tile(params["bn0_shift"], (1, W)),
        "w1": _banded_slab_weight(params["w1"], W, params["bn1_scale"][0]).astype(DTYPE_MM),
        "bn1b": jnp.tile(params["bn1_shift"], (1, W)),                                  # (1, W*M)
        "w2": _banded_slab_weight(params["w2"], W, params["bn2_scale"][0]).astype(DTYPE_MM),
        "bn2b": jnp.tile(params["bn2_shift"], (1, W)),
        "w3": _banded_slab_weight(params["w3"], W).astype(DTYPE_MM),
    }


# ----------------------------------------------------------------------------- wrapper ----
def irevnet_block_forward_slab(x1_slab, x2_slab, packed, N, H, W, C, M):
    """Slab-format forward: x1/x2 as (N*H, W*C) f32, returns y1 as (N*H, W*C) f32."""
    WC, WM = W * C, W * M

    flops = N * sum(
        2 * (2 * H * H * (W * cin)) + 3 * (2 * H * (W * cin) * (W * cout))
        for cin, cout in ((C, M), (M, M), (M, C)))
    bytes_accessed = int(3 * x1_slab.size * 4
                         + sum(int(v.size) * v.dtype.itemsize for v in packed.values()))

    def const_spec(shape):
        return pl.BlockSpec(shape, lambda n: (0,) * len(shape))

    return pl.pallas_call(
        _irevnet_block_kernel,
        out_shape=jax.ShapeDtypeStruct((N * H, WC), jnp.float32),
        grid=(N,),
        in_specs=[
            pl.BlockSpec((H, WC), lambda n: (n, 0)),       # x1 (one image per grid step)
            pl.BlockSpec((H, WC), lambda n: (n, 0)),       # x2
            const_spec((H, H)),                            # s_up
            const_spec((H, H)),                            # s_dn
            const_spec((1, WC)),                           # bn0 scale (tiled)
            const_spec((1, WC)),                           # bn0 shift (tiled)
            const_spec((3, WC, WM)),                       # w1 (banded, bn1 scale folded)
            const_spec((1, WM)),                           # bn1 shift (tiled)
            const_spec((3, WM, WM)),                       # w2 (banded, bn2 scale folded)
            const_spec((1, WM)),                           # bn2 shift (tiled)
            const_spec((3, WM, WC)),                       # w3 (banded)
        ],
        out_specs=pl.BlockSpec((H, WC), lambda n: (n, 0)),
        compiler_params=pltpu.CompilerParams(
            dimension_semantics=("parallel",),
            vmem_limit_bytes=32 * 1024 * 1024),
        cost_estimate=pl.CostEstimate(
            flops=flops, transcendentals=0, bytes_accessed=bytes_accessed),
    )(x1_slab, x2_slab, packed["s_up"], packed["s_dn"],
      packed["bn0s"], packed["bn0b"], packed["w1"], packed["bn1b"],
      packed["w2"], packed["bn2b"], packed["w3"])


def irevnet_block_forward(x1_nchw, x2_nchw, params):
    """Mirrors irevnet_block.forward((x1, x2)) -> (x2, y1) for pad == 0, stride == 1."""
    N, C, H, W = x2_nchw.shape
    M = params["w1"].shape[3]
    # TODO(synk): when chaining i-RevNet blocks, keep activations in the (N*H, W*C) slab
    # layout between blocks and drop these NCHW<->slab transposes from the steady state.
    x1_slab = jnp.transpose(x1_nchw, (0, 2, 3, 1)).reshape(N * H, W * C)
    x2_slab = jnp.transpose(x2_nchw, (0, 2, 3, 1)).reshape(N * H, W * C)
    packed = pack_params(params, H, W)
    y1_slab = irevnet_block_forward_slab(x1_slab, x2_slab, packed, N, H, W, C, M)
    y1 = jnp.transpose(y1_slab.reshape(N, H, W, C), (0, 3, 1, 2))
    # forward returns (x2, y1)
    return x2_nchw, y1


# --------------------------------------------------------------------------- reference ----
def reference_forward(x1_nchw, x2_nchw, params):
    """Plain-JAX reference of the same forward (for correctness check)."""
    x1 = jnp.transpose(x1_nchw, (0, 2, 3, 1))
    x2 = jnp.transpose(x2_nchw, (0, 2, 3, 1))

    def conv(a, w):
        return jax.lax.conv_general_dilated(
            a, w, window_strides=(1, 1), padding="SAME",
            dimension_numbers=("NHWC", "HWIO", "NHWC"))

    a = jnp.maximum(x2 * params["bn0_scale"][0] + params["bn0_shift"][0], 0.0)
    a = conv(a, params["w1"])
    a = jnp.maximum(a * params["bn1_scale"][0] + params["bn1_shift"][0], 0.0)
    a = conv(a, params["w2"])
    a = jnp.maximum(a * params["bn2_scale"][0] + params["bn2_shift"][0], 0.0)
    fx2 = conv(a, params["w3"])
    y1 = fx2 + x1
    return x2_nchw, jnp.transpose(y1, (0, 3, 1, 2))


def init_params(key, in_ch, out_ch, mult=4):
    """Deterministic synthetic parameters matching irevnet_block.__init__ shapes.

    Conv weights are stored HWIO (3, 3, cin, cout) (PyTorch's (cout, cin, 3, 3) transposed).
    BN is folded into scale/shift (eval mode, running_mean=0, running_var=1).
    """
    C = in_ch // 2              # channels of x2 / input to the bottleneck
    M = int(out_ch // mult)     # bottleneck width
    ks = jax.random.split(key, 9)
    eps = 1e-5

    def bn_params(kg, kb, c):
        gamma = 1.0 + 0.1 * jax.random.normal(kg, (1, c), jnp.float32)
        beta = 0.1 * jax.random.normal(kb, (1, c), jnp.float32)
        scale = gamma / jnp.sqrt(1.0 + eps)   # running_var = 1
        shift = beta                          # running_mean = 0
        return scale, shift

    def conv_w(k, cin, cout):
        std = 1.0 / jnp.sqrt(jnp.float32(cin * 9))
        return std * jax.random.normal(k, (3, 3, cin, cout), jnp.float32)

    bn0_scale, bn0_shift = bn_params(ks[0], ks[1], C)
    bn1_scale, bn1_shift = bn_params(ks[2], ks[3], M)
    bn2_scale, bn2_shift = bn_params(ks[4], ks[5], M)
    return {
        "bn0_scale": bn0_scale, "bn0_shift": bn0_shift,
        "w1": conv_w(ks[6], C, M),
        "bn1_scale": bn1_scale, "bn1_shift": bn1_shift,
        "w2": conv_w(ks[7], M, M),
        "bn2_scale": bn2_scale, "bn2_shift": bn2_shift,
        "w3": conv_w(ks[8], M, out_ch),
    }


if __name__ == "__main__":
    # Module config: in_ch=16, out_ch=8, stride=1, first=False, mult=4
    #   -> pad = 2*8 - 16 = 0 (bijective path), x1/x2 each have in_ch//2 = 8 channels.
    in_ch, out_ch, mult = 16, 8, 4
    N, H, W = 2, 16, 16
    C = in_ch // 2

    key = jax.random.PRNGKey(0)
    k1, k2, kp = jax.random.split(key, 3)
    # PyTorch-convention NCHW inputs
    x1 = jax.random.normal(k1, (N, C, H, W), jnp.float32)
    x2 = jax.random.normal(k2, (N, C, H, W), jnp.float32)
    params = init_params(kp, in_ch, out_ch, mult)

    out_x2, y1 = irevnet_block_forward(x1, x2, params)
    jax.block_until_ready(y1)

    ref_x2, ref_y1 = reference_forward(x1, x2, params)
    assert jnp.allclose(out_x2, x2)
    # bf16 matmul operands (f32 accumulate) -> tolerance loosened vs the f32 reference.
    assert jnp.allclose(y1, ref_y1, atol=2e-2, rtol=2e-2), (
        float(jnp.max(jnp.abs(y1 - ref_y1))))

    print("KERNEL_OK")
</pallas_src>

<mosaic_0001>
module attributes {stable_mosaic.version = 11 : i64} {
  func.func @_irevnet_block_kernel(%arg0: i32, %arg1: memref<16x128xf32, #tpu.memory_space<vmem>>, %arg2: memref<16x128xf32, #tpu.memory_space<vmem>>, %arg3: memref<16x16xbf16, #tpu.memory_space<vmem>>, %arg4: memref<16x16xbf16, #tpu.memory_space<vmem>>, %arg5: memref<1x128xf32, #tpu.memory_space<vmem>>, %arg6: memref<1x128xf32, #tpu.memory_space<vmem>>, %arg7: memref<3x128x32xbf16, #tpu.memory_space<vmem>>, %arg8: memref<1x32xf32, #tpu.memory_space<vmem>>, %arg9: memref<3x32x32xbf16, #tpu.memory_space<vmem>>, %arg10: memref<1x32xf32, #tpu.memory_space<vmem>>, %arg11: memref<3x32x128xbf16, #tpu.memory_space<vmem>>, %arg12: memref<16x128xf32, #tpu.memory_space<vmem>>) attributes {dimension_semantics = [#tpu.dimension_semantics<parallel>], iteration_bounds = array<i64: 2>, scalar_prefetch = 0 : i64, scratch_operands = 0 : i64, tpu.core_type = #tpu.core_type<tc>, window_params = [{transform_indices = @transform_0, window_bounds = array<i64: 16, 128>}, {transform_indices = @transform_1, window_bounds = array<i64: 16, 128>}, {pipeline_mode = #tpu.pipeline_mode<synchronous>, transform_indices = @transform_2, window_bounds = array<i64: 16, 16>}, {pipeline_mode = #tpu.pipeline_mode<synchronous>, transform_indices = @transform_3, window_bounds = array<i64: 16, 16>}, {pipeline_mode = #tpu.pipeline_mode<synchronous>, transform_indices = @transform_4, window_bounds = array<i64: 1, 128>}, {pipeline_mode = #tpu.pipeline_mode<synchronous>, transform_indices = @transform_5, window_bounds = array<i64: 1, 128>}, {pipeline_mode = #tpu.pipeline_mode<synchronous>, transform_indices = @transform_6, window_bounds = array<i64: 3, 128, 32>}, {pipeline_mode = #tpu.pipeline_mode<synchronous>, transform_indices = @transform_7, window_bounds = array<i64: 1, 32>}, {pipeline_mode = #tpu.pipeline_mode<synchronous>, transform_indices = @transform_8, window_bounds = array<i64: 3, 32, 32>}, {pipeline_mode = #tpu.pipeline_mode<synchronous>, transform_indices = @transform_9, window_bounds = array<i64: 1, 32>}, {pipeline_mode = #tpu.pipeline_mode<synchronous>, transform_indices = @transform_10, window_bounds = array<i64: 3, 32, 128>}, {transform_indices = @transform_11, window_bounds = array<i64: 16, 128>}]} {
    %c0 = arith.constant 0 : index
    %c0_0 = arith.constant 0 : index
    %0 = vector.load %arg3[%c0, %c0_0] : memref<16x16xbf16, #tpu.memory_space<vmem>>, vector<16x16xbf16>
    %c0_1 = arith.constant 0 : index
    %c0_2 = arith.constant 0 : index
    %1 = vector.load %arg4[%c0_1, %c0_2] : memref<16x16xbf16, #tpu.memory_space<vmem>>, vector<16x16xbf16>
    %c0_3 = arith.constant 0 : index
    %c0_4 = arith.constant 0 : index
    %2 = vector.load %arg2[%c0_3, %c0_4] : memref<16x128xf32, #tpu.memory_space<vmem>>, vector<16x128xf32>
    %c0_5 = arith.constant 0 : index
    %c0_6 = arith.constant 0 : index
    %3 = vector.load %arg5[%c0_5, %c0_6] : memref<1x128xf32, #tpu.memory_space<vmem>>, vector<1x128xf32>
    %4 = vector.broadcast %3 : vector<1x128xf32> to vector<16x128xf32>
    %5 = arith.mulf %2, %4 : vector<16x128xf32>
    %c0_7 = arith.constant 0 : index
    %c0_8 = arith.constant 0 : index
    %6 = vector.load %arg6[%c0_7, %c0_8] : memref<1x128xf32, #tpu.memory_space<vmem>>, vector<1x128xf32>
    %7 = vector.broadcast %6 : vector<1x128xf32> to vector<16x128xf32>
    %8 = arith.addf %5, %7 : vector<16x128xf32>
    %cst = arith.constant 0.000000e+00 : f32
    %9 = vector.broadcast %cst : f32 to vector<16x128xf32>
    %10 = arith.maximumf %8, %9 : vector<16x128xf32>
    %11 = arith.truncf %10 : vector<16x128xf32> to vector<16x128xbf16>
    %cst_9 = arith.constant dense<0.000000e+00> : vector<16x128xf32>
    %12 = tpu.matmul %0, %11, %cst_9 {dimension_numbers = #tpu.dot_dimension_numbers<[1], [0], [0], [1], [0, 0, 1, 1], [], []>} : vector<16x16xbf16>, vector<16x128xbf16>, vector<16x128xf32> -> vector<16x128xf32>
    %13 = arith.truncf %12 : vector<16x128xf32> to vector<16x128xbf16>
    %cst_10 = arith.constant dense<0.000000e+00> : vector<16x128xf32>
    %14 = tpu.matmul %1, %11, %cst_10 {dimension_numbers = #tpu.dot_dimension_numbers<[1], [0], [0], [1], [0, 0, 1, 1], [], []>} : vector<16x16xbf16>, vector<16x128xbf16>, vector<16x128xf32> -> vector<16x128xf32>
    %15 = arith.truncf %14 : vector<16x128xf32> to vector<16x128xbf16>
    %c0_11 = arith.constant 0 : index
    %c0_12 = arith.constant 0 : index
    %c0_13 = arith.constant 0 : index
    %16 = vector.load %arg7[%c0_11, %c0_12, %c0_13] : memref<3x128x32xbf16, #tpu.memory_space<vmem>>, vector<1x128x32xbf16>
    %17 = vector.shape_cast %16 : vector<1x128x32xbf16> to vector<128x32xbf16>
    %cst_14 = arith.constant dense<0.000000e+00> : vector<16x32xf32>
    %18 = tpu.matmul %13, %17, %cst_14 {dimension_numbers = #tpu.dot_dimension_numbers<[1], [0], [0], [1], [0, 0, 1, 1], [], []>} : vector<16x128xbf16>, vector<128x32xbf16>, vector<16x32xf32> -> vector<16x32xf32>
    %c1 = arith.constant 1 : index
    %c0_15 = arith.constant 0 : index
    %c0_16 = arith.constant 0 : index
    %19 = vector.load %arg7[%c1, %c0_15, %c0_16] : memref<3x128x32xbf16, #tpu.memory_space<vmem>>, vector<1x128x32xbf16>
    %20 = vector.shape_cast %19 : vector<1x128x32xbf16> to vector<128x32xbf16>
    %cst_17 = arith.constant dense<0.000000e+00> : vector<16x32xf32>
    %21 = tpu.matmul %11, %20, %cst_17 {dimension_numbers = #tpu.dot_dimension_numbers<[1], [0], [0], [1], [0, 0, 1, 1], [], []>} : vector<16x128xbf16>, vector<128x32xbf16>, vector<16x32xf32> -> vector<16x32xf32>
    %22 = arith.addf %18, %21 : vector<16x32xf32>
    %c2 = arith.constant 2 : index
    %c0_18 = arith.constant 0 : index
    %c0_19 = arith.constant 0 : index
    %23 = vector.load %arg7[%c2, %c0_18, %c0_19] : memref<3x128x32xbf16, #tpu.memory_space<vmem>>, vector<1x128x32xbf16>
    %24 = vector.shape_cast %23 : vector<1x128x32xbf16> to vector<128x32xbf16>
    %cst_20 = arith.constant dense<0.000000e+00> : vector<16x32xf32>
    %25 = tpu.matmul %15, %24, %cst_20 {dimension_numbers = #tpu.dot_dimension_numbers<[1], [0], [0], [1], [0, 0, 1, 1], [], []>} : vector<16x128xbf16>, vector<128x32xbf16>, vector<16x32xf32> -> vector<16x32xf32>
    %26 = arith.addf %22, %25 : vector<16x32xf32>
    %c0_21 = arith.constant 0 : index
    %c0_22 = arith.constant 0 : index
    %27 = vector.load %arg8[%c0_21, %c0_22] : memref<1x32xf32, #tpu.memory_space<vmem>>, vector<1x32xf32>
    %28 = vector.broadcast %27 : vector<1x32xf32> to vector<16x32xf32>
    %29 = arith.addf %26, %28 : vector<16x32xf32>
    %cst_23 = arith.constant 0.000000e+00 : f32
    %30 = vector.broadcast %cst_23 : f32 to vector<16x32xf32>
    %31 = arith.maximumf %29, %30 : vector<16x32xf32>
    %32 = arith.truncf %31 : vector<16x32xf32> to vector<16x32xbf16>
    %cst_24 = arith.constant dense<0.000000e+00> : vector<16x32xf32>
    %33 = tpu.matmul %0, %32, %cst_24 {dimension_numbers = #tpu.dot_dimension_numbers<[1], [0], [0], [1], [0, 0, 1, 1], [], []>} : vector<16x16xbf16>, vector<16x32xbf16>, vector<16x32xf32> -> vector<16x32xf32>
    %34 = arith.truncf %33 : vector<16x32xf32> to vector<16x32xbf16>
    %cst_25 = arith.constant dense<0.000000e+00> : vector<16x32xf32>
    %35 = tpu.matmul %1, %32, %cst_25 {dimension_numbers = #tpu.dot_dimension_numbers<[1], [0], [0], [1], [0, 0, 1, 1], [], []>} : vector<16x16xbf16>, vector<16x32xbf16>, vector<16x32xf32> -> vector<16x32xf32>
    %36 = arith.truncf %35 : vector<16x32xf32> to vector<16x32xbf16>
    %c0_26 = arith.constant 0 : index
    %c0_27 = arith.constant 0 : index
    %c0_28 = arith.constant 0 : index
    %37 = vector.load %arg9[%c0_26, %c0_27, %c0_28] : memref<3x32x32xbf16, #tpu.memory_space<vmem>>, vector<1x32x32xbf16>
    %38 = vector.shape_cast %37 : vector<1x32x32xbf16> to vector<32x32xbf16>
    %cst_29 = arith.constant dense<0.000000e+00> : vector<16x32xf32>
    %39 = tpu.matmul %34, %38, %cst_29 {dimension_numbers = #tpu.dot_dimension_numbers<[1], [0], [0], [1], [0, 0, 1, 1], [], []>} : vector<16x32xbf16>, vector<32x32xbf16>, vector<16x32xf32> -> vector<16x32xf32>
    %c1_30 = arith.constant 1 : index
    %c0_31 = arith.constant 0 : index
    %c0_32 = arith.constant 0 : index
    %40 = vector.load %arg9[%c1_30, %c0_31, %c0_32] : memref<3x32x32xbf16, #tpu.memory_space<vmem>>, vector<1x32x32xbf16>
    %41 = vector.shape_cast %40 : vector<1x32x32xbf16> to vector<32x32xbf16>
    %cst_33 = arith.constant dense<0.000000e+00> : vector<16x32xf32>
    %42 = tpu.matmul %32, %41, %cst_33 {dimension_numbers = #tpu.dot_dimension_numbers<[1], [0], [0], [1], [0, 0, 1, 1], [], []>} : vector<16x32xbf16>, vector<32x32xbf16>, vector<16x32xf32> -> vector<16x32xf32>
    %43 = arith.addf %39, %42 : vector<16x32xf32>
    %c2_34 = arith.constant 2 : index
    %c0_35 = arith.constant 0 : index
    %c0_36 = arith.constant 0 : index
    %44 = vector.load %arg9[%c2_34, %c0_35, %c0_36] : memref<3x32x32xbf16, #tpu.memory_space<vmem>>, vector<1x32x32xbf16>
    %45 = vector.shape_cast %44 : vector<1x32x32xbf16> to vector<32x32xbf16>
    %cst_37 = arith.constant dense<0.000000e+00> : vector<16x32xf32>
    %46 = tpu.matmul %36, %45, %cst_37 {dimension_numbers = #tpu.dot_dimension_numbers<[1], [0], [0], [1], [0, 0, 1, 1], [], []>} : vector<16x32xbf16>, vector<32x32xbf16>, vector<16x32xf32> -> vector<16x32xf32>
    %47 = arith.addf %43, %46 : vector<16x32xf32>
    %c0_38 = arith.constant 0 : index
    %c0_39 = arith.constant 0 : index
    %48 = vector.load %arg10[%c0_38, %c0_39] : memref<1x32xf32, #tpu.memory_space<vmem>>, vector<1x32xf32>
    %49 = vector.broadcast %48 : vector<1x32xf32> to vector<16x32xf32>
    %50 = arith.addf %47, %49 : vector<16x32xf32>
    %cst_40 = arith.constant 0.000000e+00 : f32
    %51 = vector.broadcast %cst_40 : f32 to vector<16x32xf32>
    %52 = arith.maximumf %50, %51 : vector<16x32xf32>
    %53 = arith.truncf %52 : vector<16x32xf32> to vector<16x32xbf16>
    %cst_41 = arith.constant dense<0.000000e+00> : vector<16x32xf32>
    %54 = tpu.matmul %0, %53, %cst_41 {dimension_numbers = #tpu.dot_dimension_numbers<[1], [0], [0], [1], [0, 0, 1, 1], [], []>} : vector<16x16xbf16>, vector<16x32xbf16>, vector<16x32xf32> -> vector<16x32xf32>
    %55 = arith.truncf %54 : vector<16x32xf32> to vector<16x32xbf16>
    %cst_42 = arith.constant dense<0.000000e+00> : vector<16x32xf32>
    %56 = tpu.matmul %1, %53, %cst_42 {dimension_numbers = #tpu.dot_dimension_numbers<[1], [0], [0], [1], [0, 0, 1, 1], [], []>} : vector<16x16xbf16>, vector<16x32xbf16>, vector<16x32xf32> -> vector<16x32xf32>
    %57 = arith.truncf %56 : vector<16x32xf32> to vector<16x32xbf16>
    %c0_43 = arith.constant 0 : index
    %c0_44 = arith.constant 0 : index
    %c0_45 = arith.constant 0 : index
    %58 = vector.load %arg11[%c0_43, %c0_44, %c0_45] : memref<3x32x128xbf16, #tpu.memory_space<vmem>>, vector<1x32x128xbf16>
    %59 = vector.shape_cast %58 : vector<1x32x128xbf16> to vector<32x128xbf16>
    %cst_46 = arith.constant dense<0.000000e+00> : vector<16x128xf32>
    %60 = tpu.matmul %55, %59, %cst_46 {dimension_numbers = #tpu.dot_dimension_numbers<[1], [0], [0], [1], [0, 0, 1, 1], [], []>} : vector<16x32xbf16>, vector<32x128xbf16>, vector<16x128xf32> -> vector<16x128xf32>
    %c1_47 = arith.constant 1 : index
    %c0_48 = arith.constant 0 : index
    %c0_49 = arith.constant 0 : index
    %61 = vector.load %arg11[%c1_47, %c0_48, %c0_49] : memref<3x32x128xbf16, #tpu.memory_space<vmem>>, vector<1x32x128xbf16>
    %62 = vector.shape_cast %61 : vector<1x32x128xbf16> to vector<32x128xbf16>
    %cst_50 = arith.constant dense<0.000000e+00> : vector<16x128xf32>
    %63 = tpu.matmul %53, %62, %cst_50 {dimension_numbers = #tpu.dot_dimension_numbers<[1], [0], [0], [1], [0, 0, 1, 1], [], []>} : vector<16x32xbf16>, vector<32x128xbf16>, vector<16x128xf32> -> vector<16x128xf32>
    %64 = arith.addf %60, %63 : vector<16x128xf32>
    %c2_51 = arith.constant 2 : index
    %c0_52 = arith.constant 0 : index
    %c0_53 = arith.constant 0 : index
    %65 = vector.load %arg11[%c2_51, %c0_52, %c0_53] : memref<3x32x128xbf16, #tpu.memory_space<vmem>>, vector<1x32x128xbf16>
    %66 = vector.shape_cast %65 : vector<1x32x128xbf16> to vector<32x128xbf16>
    %cst_54 = arith.constant dense<0.000000e+00> : vector<16x128xf32>
    %67 = tpu.matmul %57, %66, %cst_54 {dimension_numbers = #tpu.dot_dimension_numbers<[1], [0], [0], [1], [0, 0, 1, 1], [], []>} : vector<16x32xbf16>, vector<32x128xbf16>, vector<16x128xf32> -> vector<16x128xf32>
    %68 = arith.addf %64, %67 : vector<16x128xf32>
    %c0_55 = arith.constant 0 : index
    %c0_56 = arith.constant 0 : index
    %69 = vector.load %arg1[%c0_55, %c0_56] : memref<16x128xf32, #tpu.memory_space<vmem>>, vector<16x128xf32>
    %70 = arith.addf %68, %69 : vector<16x128xf32>
    %c0_57 = arith.constant 0 : index
    %c0_58 = arith.constant 0 : index
    %71 = vector.load %arg12[%c0_57, %c0_58] : memref<16x128xf32, #tpu.memory_space<vmem>>, vector<16x128xf32>
    tpu.vector_store %arg12[%c0_57, %c0_58], %70 {strides = array<i32>} : memref<16x128xf32, #tpu.memory_space<vmem>>, vector<16x128xf32>,
    return
  }
  func.func @transform_0(%arg0: i32) -> (i32, i32) {
    %c0_i32 = arith.constant 0 : i32
    %c0_i32_0 = arith.constant 0 : i32
    return %arg0, %c0_i32 : i32, i32
  }
  func.func @transform_1(%arg0: i32) -> (i32, i32) {
    %c0_i32 = arith.constant 0 : i32
    %c0_i32_0 = arith.constant 0 : i32
    return %arg0, %c0_i32 : i32, i32
  }
  func.func @transform_2(%arg0: i32) -> (i32, i32) {
    %c0_i32 = arith.constant 0 : i32
    %c0_i32_0 = arith.constant 0 : i32
    %c0_i32_1 = arith.constant 0 : i32
    return %c0_i32, %c0_i32_0 : i32, i32
  }
  func.func @transform_3(%arg0: i32) -> (i32, i32) {
    %c0_i32 = arith.constant 0 : i32
    %c0_i32_0 = arith.constant 0 : i32
    %c0_i32_1 = arith.constant 0 : i32
    return %c0_i32, %c0_i32_0 : i32, i32
  }
  func.func @transform_4(%arg0: i32) -> (i32, i32) {
    %c0_i32 = arith.constant 0 : i32
    %c0_i32_0 = arith.constant 0 : i32
    %c0_i32_1 = arith.constant 0 : i32
    return %c0_i32, %c0_i32_0 : i32, i32
  }
  func.func @transform_5(%arg0: i32) -> (i32, i32) {
    %c0_i32 = arith.constant 0 : i32
    %c0_i32_0 = arith.constant 0 : i32
    %c0_i32_1 = arith.constant 0 : i32
    return %c0_i32, %c0_i32_0 : i32, i32
  }
  func.func @transform_6(%arg0: i32) -> (i32, i32, i32) {
    %c0_i32 = arith.constant 0 : i32
    %c0_i32_0 = arith.constant 0 : i32
    %c0_i32_1 = arith.constant 0 : i32
    %c0_i32_2 = arith.constant 0 : i32
    return %c0_i32, %c0_i32_0, %c0_i32_1 : i32, i32, i32
  }
  func.func @transform_7(%arg0: i32) -> (i32, i32) {
    %c0_i32 = arith.constant 0 : i32
    %c0_i32_0 = arith.constant 0 : i32
    %c0_i32_1 = arith.constant 0 : i32
    return %c0_i32, %c0_i32_0 : i32, i32
  }
  func.func @transform_8(%arg0: i32) -> (i32, i32, i32) {
    %c0_i32 = arith.constant 0 : i32
    %c0_i32_0 = arith.constant 0 : i32
    %c0_i32_1 = arith.constant 0 : i32
    %c0_i32_2 = arith.constant 0 : i32
    return %c0_i32, %c0_i32_0, %c0_i32_1 : i32, i32, i32
  }
  func.func @transform_9(%arg0: i32) -> (i32, i32) {
    %c0_i32 = arith.constant 0 : i32
    %c0_i32_0 = arith.constant 0 : i32
    %c0_i32_1 = arith.constant 0 : i32
    return %c0_i32, %c0_i32_0 : i32, i32
  }
  func.func @transform_10(%arg0: i32) -> (i32, i32, i32) {
    %c0_i32 = arith.constant 0 : i32
    %c0_i32_0 = arith.constant 0 : i32
    %c0_i32_1 = arith.constant 0 : i32
    %c0_i32_2 = arith.constant 0 : i32
    return %c0_i32, %c0_i32_0, %c0_i32_1 : i32, i32, i32
  }
  func.func @transform_11(%arg0: i32) -> (i32, i32) {
    %c0_i32 = arith.constant 0 : i32
    %c0_i32_0 = arith.constant 0 : i32
    return %arg0, %c0_i32 : i32, i32
  }
}

</mosaic_0001>

<bundles_post_ra>
// kernel: tpu_custom_call.1
= control target key start
LH: loop header
LB: loop body
LE: loop exit
PB: predicated region body
PF: predicated region fallthrough
CT: control target
= control target key end

     0   :  { %s2370_s0 = inlined_call_operand.vmem [shape: f32[32,128], index: 0, kind: input, shape index: {}]   ;;  %s2371_s1 = inlined_call_operand.vmem [shape: f32[32,128], index: 1, kind: input, shape index: {}]   ;;  %s2372_s2 = inlined_call_operand.vmem [shape: bf16[16,16], index: 2, kind: input, shape index: {}]   ;;  %s2373_s3 = inlined_call_operand.vmem [shape: bf16[16,16], index: 3, kind: input, shape index: {}]   ;;  %s2374_s4 = inlined_call_operand.vmem [shape: f32[1,128], index: 4, kind: input, shape index: {}]   ;;  %s2375_s5 = inlined_call_operand.vmem [shape: f32[1,128], index: 5, kind: input, shape index: {}]   ;;  %s2376_s6 = inlined_call_operand.vmem [shape: bf16[3,128,32], index: 6, kind: input, shape index: {}]   ;;  %s2377_s7 = inlined_call_operand.vmem [shape: f32[1,32], index: 7, kind: input, shape index: {}]   ;;  %s2378_s8 = inlined_call_operand.vmem [shape: bf16[3,32,32], index: 8, kind: input, shape index: {}]   ;;  %s2379_s9 = inlined_call_operand.vmem [shape: f32[1,32], index: 9, kind: input, shape index: {}]   ;;  %s2380_s10 = inlined_call_operand.vmem [shape: bf16[3,32,128], index: 10, kind: input, shape index: {}]   ;;  %s2381_s11 = inlined_call_operand.hbm [shape: f32[32,128], index: 11, kind: output, shape index: {}]  }
   0x1   :  { %2382 = sst [smem:[#allocation5_spill]] %s2370_s0 }
   0x2   :  { %16 = vsyncpa [#allocation3], 0 }
   0x3   :  { %18 = vsyncpa [#allocation3 + $0x1], 0  ;;  %s2039_s17 = smov 0   ;;  %s2041_s18 = smov 0  }
   0x4   :  { %s2043_s19 = smov 0   ;;  %s2045_s20 = smov 0  }
   0x5 LB: > { %s2060_s21 = sadd.s32 4294967295, %s1972_s20   ;;  %s1513_s22 = sadd.s32 4294967294, %s1972_s20   ;;  %s1972_s20 = sphi %s2045_s20, %s2389_s20   ;;  %s1968_s19 = sphi %s2043_s19, %s2388_s19   ;;  %s1964_s18 = sphi %s2041_s18, %s2387_s18   ;;  %s1960_s17 = sphi %s2039_s17, %s2386_s17  }
   0x6   : > { %s2064_s23 = sadd.s32 1, %s1972_s20   ;;  %s272_s24 = sadd.s32 1, %s1968_s19 }
   0x7   : > { %s269_s25 = ssub.s32 %s1972_s20, %s2064_s23  ;;  %p282_p0 = scmp.ne.s32.totalorder %s1968_s19, %s1964_s18 }
   0x8   : > { %p270_p1 = scmp.eq.s32.totalorder %s269_s25, 0  ;;  %p283_p2 = scmp.eq.s32.totalorder %s2060_s21, 1 }
   0x9   : > { %p288_p3 = scmp.ne.s32.totalorder %s1964_s18, %s1960_s17  ;;  %p289_p4 = scmp.eq.s32.totalorder %s1513_s22, 1 }
   0xa   : > { %s2075_s26 = scalar_select %p270_p1, %s1968_s19, %s272_s24  }
   0xb   : > { %p2077_p5 = por %p283_p2, %p282_p0  ;;  %p2081_p6 = por %p289_p4, %p288_p3 }
   0xc   : > { %p1516_p7 = scmp.ge.s32.totalorder %s1972_s20, 1  ;;  %p352_p8 = scmp.lt.s32.totalorder %s1972_s20, 3 }
   0xe   : > { %p353_p9 = pnand %p1516_p7, %p352_p8 }
   0xf   : > { %s1518_s29 = sshll.u32 (!%p353_p9), %s2060_s21, 1  ;;  %s394_s25 = sand.u32 (!%p353_p9), 1, %s1964_s18  }
  0x10   : > { %356 = sbr.rel (%p353_p9) target bundleno = 1276 (0x4fc), region = 64  ;;  %p398_p10 = scmp.lt.s32.totalorder (!%p353_p9), %s1518_s29, 3 }
  0x11   : > { %s2385_s0 = sld [smem:[#allocation5_spill]] (!%p353_p9)  ;;  %s1517_s15 = sshll.u32 (!%p353_p9), %s394_s25, 4 }
  0x12   : > { %s2330_s12 = scalar_lea.sflag (!%p353_p9), [#allocation3], %s394_s25 }
  0x15   : > { %v1974_v0 = vmov 0.0   ;;  %vm1975_vm0 = vmmov 0   ;;  %s2391_s29 = smov (!%p398_p10, %s1518_s29), 3  ;;  %v1522_v1 = vld [vmem:[%s2374_s4] ss:$0 sm:$0xff]  ;;  %vm443_vm1 = vcmask 130048  }
  0x16   : > { %1687 = vmatprep.subr.bf16.mxu0 %v1974_v0  ;;  %1693 = vmatprep.subr.bf16.mxu1 %v1974_v0  ;;  %s1519_s13 = sshll.u32 %s2391_s29, 3  ;;  %v1523_v4 = vld [vmem:[%s2375_s5] ss:$0 sm:$0xff]  ;;  %v1876_v14 = vld [vmem:[%s2376_s6 + $0x78] sm:$0xff]   ;;  %v1877_v16 = vld [vmem:[%s2376_s6 + $0x70] sm:$0xff]   ;;  %vm975_vm2 = vcmask 261120  }
  0x17   : > { %1689 = vmatprep.mubr.msk.bf16.mxu0 %vm1975_vm0, %v1974_v0  ;;  %1695 = vmatprep.mubr.msk.bf16.mxu1 %vm1975_vm0, %v1974_v0  ;;  %s407_s16 = scalar_lea.vmem %s2371_s1, %s1519_s13  ;;  %v2111_v12 = vld [vmem:[%s2372_s2] sm:$0xff]   ;;  %v1884_v15 = vld [vmem:[%s2376_s6 + $0x38] sm:$0xff]   ;;  %v1886_v17 = vld [vmem:[%s2376_s6 + $0x30] sm:$0xff]   ;;  %s401_s14 = scalar_lea.vmem %s2385_s0, %s1519_s13 }
  0x18   : > { %v415_v2 = vld [vmem:[%s407_s16] sm:$0xff]  ;;  %v416_v3 = vld [vmem:[%s407_s16 + $0x8] sm:$0xff]  ;;  %v1880_v22 = vld [vmem:[%s2376_s6 + $0x58] sm:$0xff]   ;;  %s396_s16 = scalar_lea.vmem [#allocation2], %s1517_s15  ;;  %s1629_s29 = sshll.u32 %s2060_s21, 8 }
  0x19   : > { %v424_v5 = vmul.f32 %v1522_v1, %v415_v2  ;;  %v425_v6 = vmul.f32 %v1522_v1, %v416_v3  ;;  %v2116_v13 = vld [vmem:[%s2373_s3] sm:$0xff]   ;;  %v1878_v18 = vld [vmem:[%s2376_s6 + $0x68] sm:$0xff]   ;;  %v1892_v23 = vld [vmem:[%s2376_s6 + $0x18] sm:$0xff]   ;;  %s1439_s22 = sshll.u32 %s396_s16, 4  ;;  %s2328_s30 = scalar_lea.hbm %s2381_s11, %s1629_s29  ;;  %s2323_s22 = int_to_ptr.vmem [resolvable:$true] %s1439_s22 }
  0x1a   : > { %v1888_v19 = vld [vmem:[%s2376_s6 + $0x28] sm:$0xff]   ;;  %v1879_v20 = vld [vmem:[%s2376_s6 + $0x60] sm:$0xff]   ;;  %v1881_v24 = vld [vmem:[%s2376_s6 + $0x50] sm:$0xff]   ;;  %s1912_s21 = scalar_lea.vmem %s2323_s22, 256 }
  0x1b   : > { %v433_v7 = vadd.f32 %v1523_v4, %v424_v5  ;;  %v434_v8 = vadd.f32 %v1523_v4, %v425_v6  ;;  %v1890_v21 = vld [vmem:[%s2376_s6 + $0x20] sm:$0xff]   ;;  %v1894_v25 = vld [vmem:[%s2376_s6 + $0x10] sm:$0xff]   ;;  %v1882_v26 = vld [vmem:[%s2376_s6 + $0x48] sm:$0xff]   ;;  %p1913_p11 = scmp.ne.s32.totalorder %s2323_s22, %s1912_s21 }
  0x1c   : > { %v1883_v27 = vld [vmem:[%s2376_s6 + $0x40] sm:$0xff]   ;;  %v1885_v28 = vld [vmem:[%s2376_s6 + $0xb8] sm:$0xff]   ;;  %v1887_v29 = vld [vmem:[%s2376_s6 + $0xb0] sm:$0xff]  }
  0x1d   : > { %v435_v9 = vmax.f32 %v433_v7, 0.0  ;;  %v436_v10 = vmax.f32 %v434_v8, 0.0  ;;  %v1889_v30 = vld [vmem:[%s2376_s6 + $0xa8] sm:$0xff]   ;;  %v1891_v31 = vld [vmem:[%s2376_s6 + $0xa0] sm:$0xff]   ;;  %v1893_v32 = vld [vmem:[%s2376_s6 + $0x98] sm:$0xff]   ;;  %p1914_p12 = pnand %p1913_p11, %p2077_p5 }
  0x1e   : > { %v1895_v33 = vld [vmem:[%s2376_s6 + $0x90] sm:$0xff]   ;;  %v1896_v34 = vld [vmem:[%s2376_s6 + $0x8] sm:$0xff]   ;;  %v1898_v36 = vld [vmem:[%s2376_s6] sm:$0xff]  }
  0x1f   : > { %v437_v11 = vpack.c.bf16 %v436_v10, %v435_v9  ;;  %v1897_v35 = vld [vmem:[%s2376_s6 + $0x88] sm:$0xff]   ;;  %v1899_v37 = vld [vmem:[%s2376_s6 + $0x80] sm:$0xff]   ;;  %v1900_v7 = vld [vmem:[%s2378_s8 + $0x18] sm:$0xff]   ;;  %p1915_p13 = pneg %p1914_p12 }
  0x20   : > { %v1584_v58 = vld [vmem:[%s2377_s7] ss:$0 sm:$0xff]  ;;  %v1901_v8 = vld [vmem:[%s2378_s8 + $0x10] sm:$0xff]   ;;  %v1902_v9 = vld [vmem:[%s2378_s8 + $0x8] sm:$0xff]  }
  0x21   : > { %1688 = vmatpush3.bf16.msra.mxu0 %v437_v11  ;;  %1694 = vmatpush3.bf16.msra.mxu1 %v437_v11  ;;  %v1903_v10 = vld [vmem:[%s2378_s8] sm:$0xff]  }
  0x22   : > { %1699 = vmatprep.subr.bf16.mxu0 %v1974_v0  ;;  %1719 = vmatprep.subr.bf16.mxu1 %v1974_v0 }
  0x24   : > { %1690 = vmatmul.mubr.msk.bf16.vlgmr.msra.gmra.mxu0 %vm443_vm1, %v2111_v12  ;;  %1696 = vmatmul.mubr.msk.bf16.vlgmr.msra.gmra.mxu1 %vm443_vm1, %v2116_v13 }
  0x25   : > { %1700 = vmatpush3.bf16.msra.mxu0 %v1876_v14  ;;  %1715 = vmatprep.mubr.msk.bf16.mxu0 %vm1975_vm0, %v1974_v0  ;;  %v1905_v14 = vld [vmem:[%s2378_s8 + $0x20] sm:$0xff]  }
  0x26   : > { %1701 = vmatprep.subr.bf16.mxu0 %v1974_v0  ;;  %1720 = vmatpush3.bf16.msra.mxu1 %v1884_v15 }
  0x27   : > { %1721 = vmatprep.subr.bf16.mxu1 %v1974_v0  ;;  %1735 = vmatprep.mubr.msk.bf16.mxu1 %vm1975_vm0, %v1974_v0 }
  0x29   : > { %1702 = vmatpush3.bf16.msra.mxu0 %v1877_v16 }
  0x2a   : > { %1703 = vmatprep.subr.bf16.mxu0 %v1974_v0  ;;  %1722 = vmatpush3.bf16.msra.mxu1 %v1886_v17 }
  0x2b   : > { %1723 = vmatprep.subr.bf16.mxu1 %v1974_v0 }
  0x2d   : > { %1704 = vmatpush3.bf16.msra.mxu0 %v1878_v18 }
  0x2e   : > { %1705 = vmatprep.subr.bf16.mxu0 %v1974_v0  ;;  %1724 = vmatpush3.bf16.msra.mxu1 %v1888_v19 }
  0x2f   : > { %1725 = vmatprep.subr.bf16.mxu1 %v1974_v0 }
  0x31   : > { %1706 = vmatpush3.bf16.msra.mxu0 %v1879_v20 }
  0x32   : > { %1707 = vmatprep.subr.bf16.mxu0 %v1974_v0  ;;  %1726 = vmatpush3.bf16.msra.mxu1 %v1890_v21 }
  0x33   : > { %1727 = vmatprep.subr.bf16.mxu1 %v1974_v0 }
  0x35   : > { %1708 = vmatpush3.bf16.msra.mxu0 %v1880_v22 }
  0x36   : > { %1709 = vmatprep.subr.bf16.mxu0 %v1974_v0  ;;  %1728 = vmatpush3.bf16.msra.mxu1 %v1892_v23 }
  0x37   : > { %1729 = vmatprep.subr.bf16.mxu1 %v1974_v0 }
  0x39   : > { %1710 = vmatpush3.bf16.msra.mxu0 %v1881_v24 }
  0x3a   : > { %1711 = vmatprep.subr.bf16.mxu0 %v1974_v0  ;;  %1730 = vmatpush3.bf16.msra.mxu1 %v1894_v25 }
  0x3b   : > { %1731 = vmatprep.subr.bf16.mxu1 %v1974_v0 }
  0x3d   : > { %1712 = vmatpush3.bf16.msra.mxu0 %v1882_v26 }
  0x3e   : > { %1713 = vmatprep.subr.bf16.mxu0 %v1974_v0  ;;  %1732 = vmatpush3.bf16.msra.mxu1 %v1896_v34 }
  0x3f   : > { %1733 = vmatprep.subr.bf16.mxu1 %v1974_v0 }
  0x41   : > { %1714 = vmatpush3.bf16.msra.mxu0 %v1883_v27 }
  0x42   : > { %1739 = vmatprep.subr.bf16.mxu0 %v1974_v0  ;;  %1734 = vmatpush3.bf16.msra.mxu1 %v1898_v36  ;;  %v1604_v36 = vld [vmem:[%s2379_s9] ss:$0 sm:$0xff] }
  0x43   : > { %1759 = vmatprep.subr.bf16.mxu1 %v1974_v0 }
  0x44   : > { %1716 = vmatmul.mubr.bf16.vlgmr.msra.gmra.mxu0 %v437_v11  ;;  %v1904_v11 = vld [vmem:[%s2378_s8 + $0x28] sm:$0xff]  }
  0x45   : > { %1740 = vmatpush3.bf16.msra.mxu0 %v1885_v28  ;;  %1755 = vmatprep.mubr.msk.bf16.mxu0 %vm1975_vm0, %v1974_v0 }
  0x46   : > { %1741 = vmatprep.subr.bf16.mxu0 %v1974_v0 }
  0x49   : > { %1742 = vmatpush3.bf16.msra.mxu0 %v1887_v29 }
  0x4a   : > { %1743 = vmatprep.subr.bf16.mxu0 %v1974_v0 }
  0x4d   : > { %1744 = vmatpush3.bf16.msra.mxu0 %v1889_v30 }
  0x4e   : > { %1745 = vmatprep.subr.bf16.mxu0 %v1974_v0 }
  0x51   : > { %1746 = vmatpush3.bf16.msra.mxu0 %v1891_v31 }
  0x52   : > { %1747 = vmatprep.subr.bf16.mxu0 %v1974_v0 }
  0x55   : > { %1748 = vmatpush3.bf16.msra.mxu0 %v1893_v32 }
  0x56   : > { %1749 = vmatprep.subr.bf16.mxu0 %v1974_v0 }
  0x59   : > { %1750 = vmatpush3.bf16.msra.mxu0 %v1895_v33 }
  0x5a   : > { %1751 = vmatprep.subr.bf16.mxu0 %v1974_v0 }
  0x5d   : > { %1752 = vmatpush3.bf16.msra.mxu0 %v1897_v35 }
  0x5e   : > { %1753 = vmatprep.subr.bf16.mxu0 %v1974_v0 }
  0x61   : > { %1754 = vmatpush3.bf16.msra.mxu0 %v1899_v37 }
  0x62   : > { %1787 = vmatprep.subr.bf16.mxu0 %v1974_v0 }
  0xe4   : > { %v481_v38 = vpop.f32.mrf.mxu0  ;;  %v531_v39 = vpop.f32.mrf.mxu1 }
  0xe6   : > { %v1691_v40 = vpop.f32.mrf.mxu0  ;;  %v1697_v41 = vpop.f32.mrf.mxu1 }
  0xe8   : > { %v484_v42 = vpop.f32.mrf.mxu0  ;;  %v534_v43 = vpop.f32.mrf.mxu1 }
  0xe9   : > { %v488_v44 = vpack.c.bf16 %v484_v42, %v481_v38  ;;  %v538_v45 = vpack.c.bf16 %v534_v43, %v531_v39 }
  0xea   : > { %v1692_v46 = vpop.f32.mrf.mxu0  ;;  %v1698_v47 = vpop.f32.mrf.mxu1 }
  0xeb   : > { %1736 = vmatmul.mubr.bf16.vlgmr.msra.gmra.mxu1 %v488_v44  ;;  %1756 = vmatmul.mubr.bf16.vlgmr.msra.gmra.mxu0 %v538_v45  ;;  %v1906_v47 = vld [vmem:[%s2380_s10 + $0x18] sm:$0xff]  }
  0xec   : > { %1761 = vmatprep.mubr.msk.bf16.mxu1 %vm1975_vm0, %v1974_v0  ;;  %1791 = vmatprep.mubr.msk.bf16.mxu0 %vm1975_vm0, %v1974_v0 }
  0xed   : > { %1788 = vmatpush3.bf16.msra.mxu0 %v1904_v11 }
  0xee   : > { %1789 = vmatprep.subr.bf16.mxu0 %v1974_v0 }
  0xf1   : > { %1790 = vmatpush3.bf16.msra.mxu0 %v1905_v14  ;;  %v1420_v14 = vld [vmem:[%s401_s14 + $0x8] sm:$0xff] }
  0xf2   : > { %1801 = vmatprep.subr.bf16.mxu0 %v1974_v0 }
 0x104   : > { %v654_v48 = vpop.f32.mrf.mxu0 }
 0x106   : > { %v1717_v49 = vpop.f32.mrf.mxu0 }
 0x107   : > { %v1910_v49 = vld [vmem:[%s2380_s10] sm:$0xff]  }
 0x108   : > { %v657_v50 = vpop.f32.mrf.mxu0 }
 0x10a   : > { %v1718_v51 = vpop.f32.mrf.mxu0 }
 0x1ab   : > { %v743_v52 = vpop.f32.mrf.mxu1  ;;  %v849_v53 = vpop.f32.mrf.mxu0 }
 0x1ac   : > { %v744_v54 = vadd.f32 %v743_v52, %v654_v48  ;;  %v1907_v48 = vld [vmem:[%s2380_s10 + $0x10] sm:$0xff]  }
 0x1ad   : > { %v1737_v55 = vpop.f32.mrf.mxu1  ;;  %v1757_v56 = vpop.f32.mrf.mxu0 }
 0x1ae   : > { %v856_v57 = vadd.f32 %v849_v53, %v744_v54 }
 0x1af   : > { %v746_v59 = vpop.f32.mrf.mxu1  ;;  %v852_v60 = vpop.f32.mrf.mxu0 }
 0x1b0   : > { %v747_v61 = vadd.f32 %v746_v59, %v657_v50  ;;  %v865_v1 = vadd.f32 %v1584_v58, %v856_v57  ;;  %v1911_v50 = vld [vmem:[%s2380_s10 + $0x20] sm:$0xff]  }
 0x1b1   : > { %v1738_v62 = vpop.f32.mrf.mxu1  ;;  %v1758_v63 = vpop.f32.mrf.mxu0 }
 0x1b2   : > { %v857_v2 = vadd.f32 %v852_v60, %v747_v61  ;;  %v867_v4 = vmax.f32 %v865_v1, 0.0 }
 0x1b4   : > { %v866_v3 = vadd.f32 %v1584_v58, %v857_v2 }
 0x1b6   : > { %v868_v5 = vmax.f32 %v866_v3, 0.0 }
 0x1b8   : > { %v869_v6 = vpack.c.bf16 %v868_v5, %v867_v4  ;;  %v1419_v4 = vld [vmem:[%s401_s14] sm:$0xff]  ;;  %s1976_s14 = smov [#allocation2]  }
 0x1b9   : > { %s1916_s15 = sshll.u32 %s1976_s14, 4  ;;  %s1917_s15 = int_to_ptr.vmem [resolvable:$false] %s1916_s15 }
 0x1ba   : > { %1760 = vmatpush3.bf16.msra.mxu1 %v869_v6  ;;  %s1918_s0 = scalar_lea.vmem %s1917_s15, 512  ;;  %p1919_p0 = scmp.lt.s32.totalorder %s2323_s22, %s1917_s15 }
 0x1bb   : > { %1765 = vmatprep.subr.bf16.mxu1 %v1974_v0  ;;  %p1920_p1 = scmp.lt.s32.totalorder %s1918_s0, %s1912_s21 }
 0x1bd   : > { %1762 = vmatmul.mubr.msk.bf16.vlgmr.msra.gmra.mxu1 %vm443_vm1, %v2111_v12  ;;  %p1921_p2 = por %p1920_p1, %p1919_p0 }
 0x1be   : > { %1766 = vmatpush3.bf16.msra.mxu1 %v869_v6  ;;  %1767 = vmatprep.mubr.msk.bf16.mxu1 %vm1975_vm0, %v1974_v0 }
 0x1bf   : > { %1771 = vmatprep.subr.bf16.mxu1 %v1974_v0  ;;  %p1922_p3 = pnand %p1921_p2, %p1915_p13 }
 0x1c5   : > { %1768 = vmatmul.mubr.msk.bf16.vlgmr.msra.gmra.mxu1 %vm443_vm1, %v2116_v13 }
 0x1c6   : > { %1772 = vmatpush3.bf16.msra.mxu1 %v1900_v7  ;;  %1775 = vmatprep.mubr.msk.bf16.mxu1 %vm1975_vm0, %v1974_v0 }
 0x1c7   : > { %1773 = vmatprep.subr.bf16.mxu1 %v1974_v0 }
 0x1ca   : > { %1774 = vmatpush3.bf16.msra.mxu1 %v1901_v8 }
 0x1cb   : > { %1779 = vmatprep.subr.bf16.mxu1 %v1974_v0 }
 0x1cd   : > { %1776 = vmatmul.mubr.msk.bf16.vlgmr.msra.gmra.mxu1 %vm975_vm2, %v869_v6 }
 0x1ce   : > { %1783 = vmatprep.mubr.msk.bf16.mxu1 %vm1975_vm0, %v1974_v0  ;;  %1780 = vmatpush3.bf16.msra.mxu1 %v1902_v9 }
 0x1cf   : > { %1781 = vmatprep.subr.bf16.mxu1 %v1974_v0 }
 0x1d2   : > { %1782 = vmatpush3.bf16.msra.mxu1 %v1903_v10 }
 0x1d3   : > { %1795 = vmatprep.subr.bf16.mxu1 %v1974_v0 }
 0x27d   : > { %v904_v15 = vpop.f32.mrf.mxu1 }
 0x27f   : > { %v1763_v16 = vpop.f32.mrf.mxu1 }
 0x281   : > { %v907_v17 = vpop.f32.mrf.mxu1 }
 0x282   : > { %v911_v18 = vpack.c.bf16 %v907_v17, %v904_v15 }
 0x283   : > { %v1764_v19 = vpop.f32.mrf.mxu1 }
 0x284   : > { %1784 = vmatmul.mubr.msk.bf16.vlgmr.msra.gmra.mxu1 %vm975_vm2, %v911_v18 }
 0x285   : > { %v946_v20 = vpop.f32.mrf.mxu1  ;;  %1797 = vmatprep.mubr.msk.bf16.mxu1 %vm1975_vm0, %v1974_v0 }
 0x287   : > { %v1769_v21 = vpop.f32.mrf.mxu1 }
 0x289   : > { %v949_v22 = vpop.f32.mrf.mxu1 }
 0x28a   : > { %v953_v23 = vpack.c.bf16 %v949_v22, %v946_v20 }
 0x28b   : > { %v1770_v24 = vpop.f32.mrf.mxu1 }
 0x28c   : > { %1792 = vmatmul.mubr.msk.bf16.vlgmr.msra.gmra.mxu0 %vm975_vm2, %v953_v23 }
 0x28d   : > { %v1013_v25 = vpop.f32.mrf.mxu1  ;;  %1803 = vmatprep.mubr.msk.bf16.mxu0 %vm1975_vm0, %v1974_v0 }
 0x28f   : > { %v1777_v26 = vpop.f32.mrf.mxu1 }
 0x291   : > { %v1016_v27 = vpop.f32.mrf.mxu1 }
 0x293   : > { %v1778_v28 = vpop.f32.mrf.mxu1 }
 0x344   : > { %v1069_v29 = vpop.f32.mrf.mxu1 }
 0x345   : > { %v1070_v33 = vadd.f32 %v1069_v29, %v1013_v25 }
 0x346   : > { %v1785_v30 = vpop.f32.mrf.mxu1 }
 0x348   : > { %v1072_v31 = vpop.f32.mrf.mxu1 }
 0x349   : > { %v1073_v38 = vadd.f32 %v1072_v31, %v1016_v27 }
 0x34a   : > { %v1786_v32 = vpop.f32.mrf.mxu1 }
 0x34c   : > { %v1130_v34 = vpop.f32.mrf.mxu0 }
 0x34d   : > { %v1137_v35 = vadd.f32 %v1130_v34, %v1070_v33 }
 0x34e   : > { %v1793_v37 = vpop.f32.mrf.mxu0 }
 0x34f   : > { %v1146_v40 = vadd.f32 %v1604_v36, %v1137_v35 }
 0x350   : > { %v1133_v39 = vpop.f32.mrf.mxu0 }
 0x351   : > { %v1138_v41 = vadd.f32 %v1133_v39, %v1073_v38  ;;  %v1148_v44 = vmax.f32 %v1146_v40, 0.0 }
 0x352   : > { %v1794_v42 = vpop.f32.mrf.mxu0 }
 0x353   : > { %v1147_v43 = vadd.f32 %v1604_v36, %v1138_v41 }
 0x355   : > { %v1149_v45 = vmax.f32 %v1147_v43, 0.0 }
 0x357   : > { %v1150_v46 = vpack.c.bf16 %v1149_v45, %v1148_v44 }
 0x359   : > { %1796 = vmatpush3.bf16.msra.mxu1 %v1150_v46  ;;  %1802 = vmatpush3.bf16.msra.mxu0 %v1150_v46 }
 0x35a   : > { %1807 = vmatprep.subr.bf16.mxu1 %v1974_v0  ;;  %1815 = vmatprep.subr.bf16.mxu0 %v1974_v0 }
 0x35c   : > { %1798 = vmatmul.mubr.msk.bf16.vlgmr.msra.gmra.mxu1 %vm443_vm1, %v2111_v12  ;;  %1804 = vmatmul.mubr.msk.bf16.vlgmr.msra.gmra.mxu0 %vm443_vm1, %v2116_v13  ;;  %v1908_v12 = vld [vmem:[%s2380_s10 + $0x8] sm:$0xff]  }
 0x35d   : > { %1808 = vmatpush3.bf16.msra.mxu1 %v1906_v47  ;;  %1811 = vmatprep.mubr.msk.bf16.mxu1 %vm1975_vm0, %v1974_v0  ;;  %v1909_v13 = vld [vmem:[%s2380_s10 + $0x28] sm:$0xff]  }
 0x35e   : > { %1809 = vmatprep.subr.bf16.mxu1 %v1974_v0  ;;  %1819 = vmatprep.mubr.msk.bf16.mxu0 %vm1975_vm0, %v1974_v0 }
 0x35f   : > { %1816 = vmatpush3.bf16.msra.mxu0 %v1908_v12 }
 0x360   : > { %1817 = vmatprep.subr.bf16.mxu0 %v1974_v0 }
 0x361   : > { %1810 = vmatpush3.bf16.msra.mxu1 %v1907_v48 }
 0x362   : > { %1823 = vmatprep.subr.bf16.mxu1 %v1974_v0 }
 0x363   : > { %1818 = vmatpush3.bf16.msra.mxu0 %v1910_v49 }
 0x364   : > { %1812 = vmatmul.mubr.msk.bf16.vlgmr.msra.gmra.mxu1 %vm975_vm2, %v1150_v46 }
 0x365   : > { %1827 = vmatprep.mubr.msk.bf16.mxu1 %vm1975_vm0, %v1974_v0  ;;  %1824 = vmatpush3.bf16.msra.mxu1 %v1909_v13 }
 0x366   : > { %1825 = vmatprep.subr.bf16.mxu1 %v1974_v0 }
 0x369   : > { %1826 = vmatpush3.bf16.msra.mxu1 %v1911_v50 }
 0x41c   : > { %v1185_v51 = vpop.f32.mrf.mxu1  ;;  %v1227_v52 = vpop.f32.mrf.mxu0 }
 0x41e   : > { %v1799_v53 = vpop.f32.mrf.mxu1  ;;  %v1805_v54 = vpop.f32.mrf.mxu0 }
 0x420   : > { %v1188_v55 = vpop.f32.mrf.mxu1  ;;  %v1230_v56 = vpop.f32.mrf.mxu0 }
 0x421   : > { %v1192_v57 = vpack.c.bf16 %v1188_v55, %v1185_v51  ;;  %v1234_v0 = vpack.c.bf16 %v1230_v56, %v1227_v52 }
 0x422   : > { %v1800_v58 = vpop.f32.mrf.mxu1  ;;  %v1806_v59 = vpop.f32.mrf.mxu0 }
 0x423   : > { %1820 = vmatmul.mubr.msk.bf16.vlgmr.msra.gmra.mxu0 %vm975_vm2, %v1192_v57  ;;  %1828 = vmatmul.mubr.msk.bf16.vlgmr.msra.gmra.mxu1 %vm975_vm2, %v1234_v0 }
 0x424   : > { %v1293_v60 = vpop.f32.mrf.mxu1 }
 0x426   : > { %v1813_v61 = vpop.f32.mrf.mxu1 }
 0x428   : > { %v1296_v62 = vpop.f32.mrf.mxu1 }
 0x42a   : > { %v1814_v63 = vpop.f32.mrf.mxu1 }
 0x4e3   : > { %v1349_v1 = vpop.f32.mrf.mxu0  ;;  %v1410_v2 = vpop.f32.mrf.mxu1 }
 0x4e4   : > { %v1350_v3 = vadd.f32 %v1349_v1, %v1293_v60 }
 0x4e5   : > { %v1821_v5 = vpop.f32.mrf.mxu0  ;;  %v1829_v6 = vpop.f32.mrf.mxu1 }
 0x4e6   : > { %v1417_v7 = vadd.f32 %v1410_v2, %v1350_v3 }
 0x4e7   : > { %v1352_v8 = vpop.f32.mrf.mxu0  ;;  %v1413_v9 = vpop.f32.mrf.mxu1 }
 0x4e8   : > { %v1421_v10 = vadd.f32 %v1419_v4, %v1417_v7  ;;  %v1353_v11 = vadd.f32 %v1352_v8, %v1296_v62 }
 0x4e9   : > { %v1822_v15 = vpop.f32.mrf.mxu0  ;;  %v1830_v16 = vpop.f32.mrf.mxu1 }
 0x4ea   : > { %1423 = vst [vmem:[%s396_s16] sm:$0xff] %v1421_v10  ;;  %v1418_v17 = vadd.f32 %v1413_v9, %v1353_v11 }
 0x4ec   : > { %v1422_v18 = vadd.f32 %v1420_v14, %v1418_v17 }
 0x4ee   : > { %1424 = vst [vmem:[%s396_s16 + $0x8] sm:$0xff] %v1422_v18 }
 0x4ef   : > { %1925 = shalt.err (!%p1922_p3)
}
 0x4f0   : > { %s1926_s25 = scalar_lea.hbm %s2328_s30, 256  ;;  %s1930_s13 = scalar_lea.hbm %s2381_s11, 512 }
 0x4f1   : > { %p1927_p4 = scmp.ne.s32.totalorder %s2328_s30, %s1926_s25  ;;  %p1931_p9 = scmp.lt.s32.totalorder %s2328_s30, %s2381_s11 }
 0x4f2   : > { %p1932_p10 = scmp.lt.s32.totalorder %s1930_s13, %s1926_s25 }
 0x4f3   : > { %p1928_p7 = pnand %p1927_p4, %p2077_p5 }
 0x4f4   : > { %p1933_p11 = por %p1932_p10, %p1931_p9 }
 0x4f5   : > { %p1929_p8 = pneg %p1928_p7 }
 0x4f7   : > { %p1934_p12 = pnand %p1933_p11, %p1929_p8 }
 0x4f9   : > { %1937 = shalt.err (!%p1934_p12)
}
 0x4fa   : > { %s1977_s0 = smov 128   ;;  %s1978_s21 = smov 8  }
 0x4fb   : > { %1831 = dma.vmem_to_hbm [thread:$0]  (%p2077_p5), %s2323_s22, 256, %s2328_s30, %s2330_s12, %s1977_s0, %s1977_s0, %s1978_s21  }
 0x4fc PF: > { %p1837_p13 = scmp.ge.s32.totalorder %s1972_s20, 2  ;;  %s1454_s15 = sand.u32 1, %s1960_s17  }
 0x4fd   : > { %s1455_s25 = scalar_lea.sflag [#allocation3], %s1454_s15 }
 0x4fe   : > { %p1834_p0 = pnand %p1837_p13, %p2081_p6 }
 0x500   : > { %p1835_p1 = pneg %p1834_p0 }
 0x502   : > { %1955 = dma.done.wait (%p1835_p1), %s1455_s25, 256  }
 0x503   : > { %1957 = vsyncadd (%p1835_p1), %s1455_s25, 4294967040  ;;  %p21_p2 = scmp.ge.s32.totalorder %s2064_s23, 4   ;;  %s2386_s17 = smov %s1964_s18 }
 0x504   : > { %s2387_s18 = smov %s1968_s19  ;;  %s2388_s19 = smov %s2075_s26 }
 0x505   : > { %s2389_s20 = smov %s2064_s23  ;;  %23 = sbr.rel (!%p21_p2) target bundleno = 5 (0x5), region = 108 }
 0x50a   :  { %1460 = vsyncpa [#allocation3], 1 }
 0x50b   :  { %1462 = vsyncpa [#allocation3 + $0x1], 1 }

</bundles_post_ra>
